<compile_context>
chip_gen: v6e
topology: v6e:2x2x1
jax: 0.10.0
libtpu: 0.0.40
codegen_flags: <defaults>
</compile_context>

<pallas_src>
import jax
import jax.numpy as jnp
from jax.experimental import pallas as pl
from jax.experimental.pallas import tpu as pltpu


def _copy_kernel(x_ref, o_ref):
    # The entire tensor math of the module: o = x (LinearActivation identity).
    o_ref[...] = x_ref[...]


_LANE = 128
# Minimum sublane tile per element size (f32 -> 8, bf16 -> 16, int8/fp8 -> 32).
_SUBLANE_BY_ITEMSIZE = {4: 8, 2: 16, 1: 32}
# Per-buffer block byte budget (~2 MiB). With in+out double-buffered this is
# ~8 MiB of live VMEM: well under v5e's 16 MiB and v6e/v7x's 32 MiB scoped defaults.
_TARGET_BLOCK_BYTES = 2 << 20
# Lane-dense width candidates, widest first (all multiples of 128).
_WIDTH_CANDIDATES = (32768, 16384, 8192, 4096, 2048, 1024, 512, 256, 128)


@jax.jit
def _pallas_identity(x: jax.Array) -> jax.Array:
    """Identity (LinearActivation) as a lane-dense tiled Pallas copy kernel."""
    orig_shape = x.shape
    dtype = x.dtype
    n = x.size
    itemsize = jnp.dtype(dtype).itemsize

    if n == 0 or n % _LANE != 0:
        # TODO(synk): ragged tail (< one 128-lane row) — the module is a pure
        # identity, so pass the tensor through instead of a masked micro-kernel.
        return x

    # Widest lane-dense last dim that divides n exactly (no host-side padding).
    width = _LANE
    for cand in _WIDTH_CANDIDATES:
        if n % cand == 0:
            width = cand
            break
    rows = n // width
    x2d = x.reshape(rows, width)

    sub = _SUBLANE_BY_ITEMSIZE.get(itemsize, 8)

    if rows <= sub:
        # Tiny input (<= ~128 KiB): one full-array block. Block shape equal to
        # the full array dims is always legal, so no VMEM / alignment risk here.
        out2d = pl.pallas_call(
            _copy_kernel,
            out_shape=jax.ShapeDtypeStruct((rows, width), dtype),
            in_specs=[pl.BlockSpec((rows, width), lambda: (0, 0))],
            out_specs=pl.BlockSpec((rows, width), lambda: (0, 0)),
        )(x2d)
        return out2d.reshape(orig_shape)

    # Tiled path: block_rows is a multiple of the dtype's sublane minimum and
    # sized toward _TARGET_BLOCK_BYTES so DMA dominates per-step overhead.
    rows_per_target = max(sub, _TARGET_BLOCK_BYTES // (width * itemsize))
    block_rows = (rows_per_target // sub) * sub
    block_rows = min(block_rows, (rows // sub) * sub)  # never exceed the array
    block_rows = max(block_rows, sub)
    grid = (pl.cdiv(rows, block_rows),)  # ragged last block is masked by Pallas

    out2d = pl.pallas_call(
        _copy_kernel,
        out_shape=jax.ShapeDtypeStruct((rows, width), dtype),
        grid=grid,
        in_specs=[pl.BlockSpec((block_rows, width), lambda i: (i, 0))],
        out_specs=pl.BlockSpec((block_rows, width), lambda i: (i, 0)),
        compiler_params=pltpu.CompilerParams(
            dimension_semantics=("parallel",),
        ),
    )(x2d)
    return out2d.reshape(orig_shape)


class TestPallas:
    """JAX/Pallas equivalent of the PyTorch `Test` module (flag == '')."""

    def __init__(self):
        self.flag = ""  # Final default in the PyTorch module

    def __call__(self, x, meta):
        meta = dict(meta)  # meta.copy()
        if self.flag != "":
            # Dead branch under flag == '' (kept to mirror the PyTorch spec).
            score = x[:, -1:]
            y = _pallas_identity(x[:, :, :-1])
            meta["meta_y_hat"] = y
            x = jnp.concatenate((y, score), axis=1)
        else:
            # LinearActivation: identity + record into meta.
            x = _pallas_identity(x)
            meta["meta_y_hat"] = x
        # PyTorch forward unconditionally overwrites meta['meta_y_hat'] with the
        # final x before returning (matches the spec exactly).
        meta["meta_y_hat"] = x
        return x, meta


if __name__ == "__main__":
    key = jax.random.PRNGKey(0)
    # Small NCHW-style input consistent with the module's indexing assumptions.
    x = jax.random.normal(key, (2, 4, 16, 16), dtype=jnp.float32)
    meta_in = {"some_key": jnp.ones((2,), dtype=jnp.float32)}

    model = TestPallas()
    y, meta_out = model(x, meta_in)
    jax.block_until_ready(y)
    jax.block_until_ready(meta_out["meta_y_hat"])

    # Verify identity semantics and meta plumbing.
    assert y.shape == x.shape and y.dtype == x.dtype
    assert bool(jnp.all(y == x))
    assert bool(jnp.all(meta_out["meta_y_hat"] == x))
    assert "some_key" in meta_out and "some_key" in meta_in
    assert "meta_y_hat" not in meta_in  # original dict untouched (copy semantics)

    # Exercise the tiled (multi-block) path as well with a larger input.
    x_big = jax.random.normal(jax.random.PRNGKey(1), (8, 16, 64, 128), dtype=jnp.float32)
    y_big = _pallas_identity(x_big)
    jax.block_until_ready(y_big)
    assert y_big.shape == x_big.shape and bool(jnp.all(y_big == x_big))

    # Also check a bf16 input (different sublane alignment path).
    x_bf16 = jax.random.normal(jax.random.PRNGKey(2), (4, 8, 32, 128), dtype=jnp.bfloat16)
    y_bf16 = _pallas_identity(x_bf16)
    jax.block_until_ready(y_bf16)
    assert y_bf16.shape == x_bf16.shape and bool(jnp.all(y_bf16 == x_bf16))

    print("KERNEL_OK")
</pallas_src>

<mosaic_0001>
module attributes {stable_mosaic.version = 11 : i64} {
  func.func @_copy_kernel(%arg0: memref<1x2048xf32, #tpu.memory_space<vmem>>, %arg1: memref<1x2048xf32, #tpu.memory_space<vmem>>) attributes {dimension_semantics = [], scalar_prefetch = 0 : i64, scratch_operands = 0 : i64, tpu.core_type = #tpu.core_type<tc>} {
    %c0 = arith.constant 0 : index
    %c0_0 = arith.constant 0 : index
    %0 = vector.load %arg0[%c0, %c0_0] : memref<1x2048xf32, #tpu.memory_space<vmem>>, vector<1x2048xf32>
    %c0_1 = arith.constant 0 : index
    %c0_2 = arith.constant 0 : index
    %1 = vector.load %arg1[%c0_1, %c0_2] : memref<1x2048xf32, #tpu.memory_space<vmem>>, vector<1x2048xf32>
    tpu.vector_store %arg1[%c0_1, %c0_2], %0 {strides = array<i32>} : memref<1x2048xf32, #tpu.memory_space<vmem>>, vector<1x2048xf32>,
    return
  }
}

</mosaic_0001>

<bundles_post_ra>
// kernel: _pallas_identity.1
= control target key start
LH: loop header
LB: loop body
LE: loop exit
PB: predicated region body
PF: predicated region fallthrough
CT: control target
= control target key end

     0   :  { %s38_s0 = inlined_call_operand.vmem [shape: f32[1,2048], index: 0, kind: input, shape index: {}]   ;;  %s39_s1 = inlined_call_operand.vmem [shape: f32[1,2048], index: 1, kind: output, shape index: {}]  }
   0x1   :  { %v8_v0 = vld [vmem:[%s38_s0] sm:$0xff]  ;;  %v9_v1 = vld [vmem:[%s38_s0 + $0x8] sm:$0xff] }
   0x2   :  { %10 = vst [vmem:[%s39_s1] sm:$0xff] %v8_v0  ;;  %11 = vst [vmem:[%s39_s1 + $0x8] sm:$0xff] %v9_v1 }

</bundles_post_ra>
